<compile_context>
chip_gen: v7x
topology: tpu7x:2x2x1
jax: 0.10.0
libtpu: 0.0.40
codegen_flags: <defaults>
</compile_context>

<pallas_src>
import jax
import jax.numpy as jnp
from jax.experimental import pallas as pl
from jax.experimental.pallas import tpu as pltpu


def mlp_kernel(x_ref, w1_ref, b1_ref, w2_ref, b2_ref, o_ref):
    # x_ref: (in, TB)   w1_ref: (hidden, in)   b1_ref: (hidden, 1)
    # w2_ref: (hidden, out)   b2_ref: (out, 1)   o_ref: (out, TB)
    x = x_ref[...]                    # lane-dense over batch
    w1 = w1_ref[...]                  # tiny, VMEM resident
    w2 = w2_ref[...]                  # tiny, VMEM resident
    hidden, in_size = w1.shape
    out_size = o_ref.shape[0]

    # fc1 (K = in_size, e.g. 4): exact-f32 broadcast multiply-accumulate on the
    # VPU.  (32,1)*(1,TB) broadcasts are cheap; static unroll over in_size.
    h = w1[:, 0:1] * x[0:1, :]                        # (hidden, TB)
    for f in range(1, in_size):
        h = h + w1[:, f:f + 1] * x[f:f + 1, :]
    h = jnp.maximum(h + b1_ref[...], 0.0)             # bias + ReLU (VPU, f32)

    # fc2 (hidden -> out, out tiny): per-output weighted sum over the hidden
    # sublanes.  Multiplies on the VPU, the 32-row reduction on the XLU.
    for o in range(out_size):
        yo = jnp.sum(h * w2[:, o:o + 1], axis=0, keepdims=True) + b2_ref[o:o + 1, :]
        o_ref[o:o + 1, :] = yo.astype(o_ref.dtype)


_TB_MAX = 16384      # per-step work >> 0.35us pipeline overhead, VMEM-safe everywhere
_GRID_TARGET = 8     # >= 4 grid steps per TensorCore on v7x megacore at large B


def _round_up(n: int, m: int) -> int:
    return ((n + m - 1) // m) * m


def _pick_batch_tile(batch: int) -> int:
    if batch <= 4096:
        return _round_up(batch, 128)                    # one tile: pay overhead once
    tb = _round_up(pl.cdiv(batch, _GRID_TARGET), 128)   # aim for >= 8 steps ...
    return max(4096, min(_TB_MAX, tb))                  # ... but keep each step big


def forward_lane_dense(x_t, w1, b1, w2, b2):
    """Core kernel: x_t (in, B) lane-dense -> (out, B).

    Callers that can produce/consume the transposed layouts should use this
    directly (no wrapper HBM passes at all).  Params use the same convention as
    `init_params`: w1 (in, hidden), b1 (1, hidden), w2 (hidden, out), b2 (1, out).
    """
    in_size, B = x_t.shape
    hidden = w1.shape[1]
    out_size = w2.shape[1]

    w1_t = w1.T                        # (hidden, in)   tiny, VMEM resident
    b1_c = b1.reshape(hidden, 1)
    b2_c = b2.reshape(out_size, 1)     # w2 stays (hidden, out) for column slices

    tb = _pick_batch_tile(B)
    grid = (pl.cdiv(B, tb),)           # ragged last block; no jnp.pad pass

    flops = 2 * B * (in_size * hidden + hidden * out_size)
    bytes_accessed = 4 * (B * (in_size + out_size)
                          + in_size * hidden + hidden
                          + hidden * out_size + out_size)

    def resident(shape):
        # Same block index every step -> fetched once, stays VMEM-resident.
        return pl.BlockSpec(shape, lambda i: (0, 0))

    return pl.pallas_call(
        mlp_kernel,
        out_shape=jax.ShapeDtypeStruct((out_size, B), jnp.float32),
        grid=grid,
        in_specs=[
            pl.BlockSpec((in_size, tb), lambda i: (0, i)),   # x tile, lane-dense
            resident((hidden, in_size)),                     # W1^T
            resident((hidden, 1)),                           # b1
            resident((hidden, out_size)),                    # W2
            resident((out_size, 1)),                         # b2
        ],
        out_specs=pl.BlockSpec((out_size, tb), lambda i: (0, i)),
        compiler_params=pltpu.CompilerParams(
            dimension_semantics=("parallel",),               # megacore split on v7x
            vmem_limit_bytes=32 * 1024 * 1024),              # headroom on v5e (16 MiB default)
        cost_estimate=pl.CostEstimate(
            flops=flops, transcendentals=0, bytes_accessed=bytes_accessed),
    )(x_t, w1_t, b1_c, w2, b2_c)


def parabolic_motion_forward(x, w1, b1, w2, b2):
    """Drop-in forward matching the PyTorch module: x (B, in) -> (B, out)."""
    out_t = forward_lane_dense(x.T, w1, b1, w2, b2)
    return out_t.T


def init_params(key, input_size, hidden_size, output_size):
    """Deterministic synthetic init (PyTorch-style uniform fan-in bounds)."""
    k1, k2, k3, k4 = jax.random.split(key, 4)
    bound1 = 1.0 / (input_size ** 0.5)
    bound2 = 1.0 / (hidden_size ** 0.5)
    w1 = jax.random.uniform(k1, (input_size, hidden_size), jnp.float32,
                            -bound1, bound1)
    b1 = jax.random.uniform(k2, (1, hidden_size), jnp.float32, -bound1, bound1)
    w2 = jax.random.uniform(k3, (hidden_size, output_size), jnp.float32,
                            -bound2, bound2)
    b2 = jax.random.uniform(k4, (1, output_size), jnp.float32, -bound2, bound2)
    return w1, b1, w2, b2


def _ref(x, w1, b1, w2, b2):
    # Reference in (near-)exact f32 to match the kernel's exact-f32 VPU math.
    hp = jax.lax.Precision.HIGHEST
    h = jnp.maximum(jnp.dot(x, w1, precision=hp) + b1, 0.0)
    return jnp.dot(h, w2, precision=hp) + b2


if __name__ == "__main__":
    # Parabolic-motion style shapes: input = (t, v0, angle, g) -> (x, y)
    input_size, hidden_size, output_size = 4, 32, 2

    key = jax.random.PRNGKey(0)
    kp, kx = jax.random.split(key, 2)
    w1, b1, w2, b2 = init_params(kp, input_size, hidden_size, output_size)

    fwd = jax.jit(parabolic_motion_forward)

    # batch=8    -> single 128-lane ragged block
    # batch=2500 -> single 2560-lane ragged block (no pad pass)
    # batch=6000 -> tb=4096, grid=(2,), ragged tail + resident weights across steps
    for i, batch in enumerate((8, 2500, 6000)):
        kxi = jax.random.fold_in(kx, i)
        x = jax.random.normal(kxi, (batch, input_size), dtype=jnp.float32)
        out = fwd(x, w1, b1, w2, b2)
        jax.block_until_ready(out)
        assert out.shape == (batch, output_size)
        ref = _ref(x, w1, b1, w2, b2)
        assert jnp.allclose(out, ref, atol=1e-5, rtol=1e-5), (
            f"mismatch at batch={batch}")

    print("KERNEL_OK")
</pallas_src>

<mosaic_0001>
module attributes {stable_mosaic.version = 11 : i64} {
  func.func @mlp_kernel(%arg0: i32, %arg1: memref<4x128xf32, #tpu.memory_space<vmem>>, %arg2: memref<32x4xf32, #tpu.memory_space<vmem>>, %arg3: memref<32x1xf32, #tpu.memory_space<vmem>>, %arg4: memref<32x2xf32, #tpu.memory_space<vmem>>, %arg5: memref<2x1xf32, #tpu.memory_space<vmem>>, %arg6: memref<2x128xf32, #tpu.memory_space<vmem>>) attributes {dimension_semantics = [#tpu.dimension_semantics<parallel>], iteration_bounds = array<i64: 1>, scalar_prefetch = 0 : i64, scratch_operands = 0 : i64, tpu.core_type = #tpu.core_type<tc>, window_params = [{transform_indices = @transform_0, window_bounds = array<i64: 4, 128>}, {pipeline_mode = #tpu.pipeline_mode<synchronous>, transform_indices = @transform_1, window_bounds = array<i64: 32, 4>}, {pipeline_mode = #tpu.pipeline_mode<synchronous>, transform_indices = @transform_2, window_bounds = array<i64: 32, 1>}, {pipeline_mode = #tpu.pipeline_mode<synchronous>, transform_indices = @transform_3, window_bounds = array<i64: 32, 2>}, {pipeline_mode = #tpu.pipeline_mode<synchronous>, transform_indices = @transform_4, window_bounds = array<i64: 2, 1>}, {transform_indices = @transform_5, window_bounds = array<i64: 2, 128>}]} {
    %c0 = arith.constant 0 : index
    %c0_0 = arith.constant 0 : index
    %0 = vector.load %arg1[%c0, %c0_0] : memref<4x128xf32, #tpu.memory_space<vmem>>, vector<4x128xf32>
    %c0_1 = arith.constant 0 : index
    %c0_2 = arith.constant 0 : index
    %1 = vector.load %arg2[%c0_1, %c0_2] : memref<32x4xf32, #tpu.memory_space<vmem>>, vector<32x4xf32>
    %c0_3 = arith.constant 0 : index
    %c0_4 = arith.constant 0 : index
    %2 = vector.load %arg4[%c0_3, %c0_4] : memref<32x2xf32, #tpu.memory_space<vmem>>, vector<32x2xf32>
    %3 = vector.extract_strided_slice %1 {offsets = [0, 0], sizes = [32, 1], strides = [1, 1]} : vector<32x4xf32> to vector<32x1xf32>
    %4 = vector.extract_strided_slice %0 {offsets = [0, 0], sizes = [1, 128], strides = [1, 1]} : vector<4x128xf32> to vector<1x128xf32>
    %5 = vector.broadcast %3 : vector<32x1xf32> to vector<32x128xf32>
    %6 = vector.broadcast %4 : vector<1x128xf32> to vector<32x128xf32>
    %7 = arith.mulf %5, %6 : vector<32x128xf32>
    %8 = vector.extract_strided_slice %1 {offsets = [0, 1], sizes = [32, 1], strides = [1, 1]} : vector<32x4xf32> to vector<32x1xf32>
    %9 = vector.extract_strided_slice %0 {offsets = [1, 0], sizes = [1, 128], strides = [1, 1]} : vector<4x128xf32> to vector<1x128xf32>
    %10 = vector.broadcast %8 : vector<32x1xf32> to vector<32x128xf32>
    %11 = vector.broadcast %9 : vector<1x128xf32> to vector<32x128xf32>
    %12 = arith.mulf %10, %11 : vector<32x128xf32>
    %13 = arith.addf %7, %12 : vector<32x128xf32>
    %14 = vector.extract_strided_slice %1 {offsets = [0, 2], sizes = [32, 1], strides = [1, 1]} : vector<32x4xf32> to vector<32x1xf32>
    %15 = vector.extract_strided_slice %0 {offsets = [2, 0], sizes = [1, 128], strides = [1, 1]} : vector<4x128xf32> to vector<1x128xf32>
    %16 = vector.broadcast %14 : vector<32x1xf32> to vector<32x128xf32>
    %17 = vector.broadcast %15 : vector<1x128xf32> to vector<32x128xf32>
    %18 = arith.mulf %16, %17 : vector<32x128xf32>
    %19 = arith.addf %13, %18 : vector<32x128xf32>
    %20 = vector.extract_strided_slice %1 {offsets = [0, 3], sizes = [32, 1], strides = [1, 1]} : vector<32x4xf32> to vector<32x1xf32>
    %21 = vector.extract_strided_slice %0 {offsets = [3, 0], sizes = [1, 128], strides = [1, 1]} : vector<4x128xf32> to vector<1x128xf32>
    %22 = vector.broadcast %20 : vector<32x1xf32> to vector<32x128xf32>
    %23 = vector.broadcast %21 : vector<1x128xf32> to vector<32x128xf32>
    %24 = arith.mulf %22, %23 : vector<32x128xf32>
    %25 = arith.addf %19, %24 : vector<32x128xf32>
    %c0_5 = arith.constant 0 : index
    %c0_6 = arith.constant 0 : index
    %26 = vector.load %arg3[%c0_5, %c0_6] : memref<32x1xf32, #tpu.memory_space<vmem>>, vector<32x1xf32>
    %27 = vector.broadcast %26 : vector<32x1xf32> to vector<32x128xf32>
    %28 = arith.addf %25, %27 : vector<32x128xf32>
    %cst = arith.constant 0.000000e+00 : f32
    %29 = vector.broadcast %cst : f32 to vector<32x128xf32>
    %30 = arith.maximumf %28, %29 : vector<32x128xf32>
    %31 = vector.extract_strided_slice %2 {offsets = [0, 0], sizes = [32, 1], strides = [1, 1]} : vector<32x2xf32> to vector<32x1xf32>
    %32 = vector.broadcast %31 : vector<32x1xf32> to vector<32x128xf32>
    %33 = arith.mulf %30, %32 : vector<32x128xf32>
    %cst_7 = arith.constant dense<0.000000e+00> : vector<128xf32>
    %34 = vector.multi_reduction <add>, %33, %cst_7 [0] : vector<32x128xf32> to vector<128xf32>
    %35 = vector.shape_cast %34 : vector<128xf32> to vector<1x128xf32>
    %c0_8 = arith.constant 0 : index
    %c0_9 = arith.constant 0 : index
    %36 = vector.load %arg5[%c0_8, %c0_9] : memref<2x1xf32, #tpu.memory_space<vmem>>, vector<1x1xf32>
    %37 = vector.broadcast %36 : vector<1x1xf32> to vector<1x128xf32>
    %38 = arith.addf %35, %37 : vector<1x128xf32>
    %c0_10 = arith.constant 0 : index
    %c0_11 = arith.constant 0 : index
    %39 = vector.load %arg6[%c0_10, %c0_11] : memref<2x128xf32, #tpu.memory_space<vmem>>, vector<1x128xf32>
    tpu.vector_store %arg6[%c0_10, %c0_11], %38 {strides = array<i32>} : memref<2x128xf32, #tpu.memory_space<vmem>>, vector<1x128xf32>,
    %40 = vector.extract_strided_slice %2 {offsets = [0, 1], sizes = [32, 1], strides = [1, 1]} : vector<32x2xf32> to vector<32x1xf32>
    %41 = vector.broadcast %40 : vector<32x1xf32> to vector<32x128xf32>
    %42 = arith.mulf %30, %41 : vector<32x128xf32>
    %cst_12 = arith.constant dense<0.000000e+00> : vector<128xf32>
    %43 = vector.multi_reduction <add>, %42, %cst_12 [0] : vector<32x128xf32> to vector<128xf32>
    %44 = vector.shape_cast %43 : vector<128xf32> to vector<1x128xf32>
    %c1 = arith.constant 1 : index
    %c0_13 = arith.constant 0 : index
    %45 = vector.load %arg5[%c1, %c0_13] : memref<2x1xf32, #tpu.memory_space<vmem>>, vector<1x1xf32>
    %46 = vector.broadcast %45 : vector<1x1xf32> to vector<1x128xf32>
    %47 = arith.addf %44, %46 : vector<1x128xf32>
    %c1_14 = arith.constant 1 : index
    %c0_15 = arith.constant 0 : index
    %48 = vector.load %arg6[%c1_14, %c0_15] : memref<2x128xf32, #tpu.memory_space<vmem>>, vector<1x128xf32>
    tpu.vector_store %arg6[%c1_14, %c0_15], %47 {strides = array<i32>} : memref<2x128xf32, #tpu.memory_space<vmem>>, vector<1x128xf32>,
    return
  }
  func.func @transform_0(%arg0: i32) -> (i32, i32) {
    %c0_i32 = arith.constant 0 : i32
    %c0_i32_0 = arith.constant 0 : i32
    return %c0_i32, %arg0 : i32, i32
  }
  func.func @transform_1(%arg0: i32) -> (i32, i32) {
    %c0_i32 = arith.constant 0 : i32
    %c0_i32_0 = arith.constant 0 : i32
    %c0_i32_1 = arith.constant 0 : i32
    return %c0_i32, %c0_i32_0 : i32, i32
  }
  func.func @transform_2(%arg0: i32) -> (i32, i32) {
    %c0_i32 = arith.constant 0 : i32
    %c0_i32_0 = arith.constant 0 : i32
    %c0_i32_1 = arith.constant 0 : i32
    return %c0_i32, %c0_i32_0 : i32, i32
  }
  func.func @transform_3(%arg0: i32) -> (i32, i32) {
    %c0_i32 = arith.constant 0 : i32
    %c0_i32_0 = arith.constant 0 : i32
    %c0_i32_1 = arith.constant 0 : i32
    return %c0_i32, %c0_i32_0 : i32, i32
  }
  func.func @transform_4(%arg0: i32) -> (i32, i32) {
    %c0_i32 = arith.constant 0 : i32
    %c0_i32_0 = arith.constant 0 : i32
    %c0_i32_1 = arith.constant 0 : i32
    return %c0_i32, %c0_i32_0 : i32, i32
  }
  func.func @transform_5(%arg0: i32) -> (i32, i32) {
    %c0_i32 = arith.constant 0 : i32
    %c0_i32_0 = arith.constant 0 : i32
    return %c0_i32, %arg0 : i32, i32
  }
}

</mosaic_0001>

<bundles_post_ra>
// kernel: parabolic_motion_forward.1
= control target key start
LH: loop header
LB: loop body
LE: loop exit
PB: predicated region body
PF: predicated region fallthrough
CT: control target
= control target key end

     0   :  { %v311_v2 = vmov 1   ;;  %v312_v3 = vmov 0   ;;  %s403_s0 = inlined_call_operand.vmem [shape: f32[4,8], index: 0, kind: input, shape index: {}]   ;;  %s404_s1 = inlined_call_operand.vmem [shape: f32[32,4], index: 1, kind: input, shape index: {}]   ;;  %s405_s2 = inlined_call_operand.vmem [shape: f32[32,1], index: 2, kind: input, shape index: {}]   ;;  %s406_s3 = inlined_call_operand.vmem [shape: f32[32,2], index: 3, kind: input, shape index: {}]   ;;  %s407_s4 = inlined_call_operand.vmem [shape: f32[2,1], index: 4, kind: input, shape index: {}]   ;;  %s408_s5 = inlined_call_operand.hbm [shape: f32[2,8], index: 5, kind: output, shape index: {}]  }
   0x1   :  { %v24_v0 = vld [vmem:[%s404_s1 + $0x10] sm:$0xff]  ;;  %v22_v1 = vld [vmem:[%s404_s1] sm:$0xff]  ;;  %272 = vset.pattern.permute.xlu0 %v311_v2  ;;  %271 = vset.pattern.permute.xlu1 %v312_v3  ;;  %v25_v4 = vld [vmem:[%s404_s1 + $0x18] sm:$0xff] }
   0x2   :  { %42 = vperm.xlu1 %271, %v24_v0   ;;  %59 = vperm.xlu0 %272, %v22_v1  }
   0x3   :  { %10 = vsyncpa [#allocation3], 0  ;;  %v313_v5 = vmov 2   ;;  %v23_v6 = vld [vmem:[%s404_s1 + $0x8] sm:$0xff]  ;;  %v314_v7 = vmov 3   ;;  %v26_v9 = vld [vmem:[%s406_s3] sm:$0xff]  ;;  %v50_v29 = vlaneseq }
   0x4   :  { %v143_v8 = vld [vmem:[%s405_s2 + $0x8] sm:$0xff]  ;;  %v142_v10 = vld [vmem:[%s405_s2] sm:$0xff]  ;;  %v28_v11 = vld [vmem:[%s406_s3 + $0x10] sm:$0xff] }
   0x5   :  { %v144_v12 = vld [vmem:[%s405_s2 + $0x10] sm:$0xff]  ;;  %v29_v13 = vld [vmem:[%s406_s3 + $0x18] sm:$0xff]  ;;  %v244_v15 = vld [vmem:[%s407_s4 + $0x1] sm:$0x1]  ;;  %v51_v31 = vshrl.u32 %v50_v29, 7 }
   0x6   :  { %47 = vperm.xlu1 %271, %v25_v4   ;;  %274 = vset.pattern.permute.xlu0 %v313_v5  ;;  %v145_v14 = vld [vmem:[%s405_s2 + $0x18] sm:$0xff]  ;;  %v27_v16 = vld [vmem:[%s406_s3 + $0x8] sm:$0xff]  ;;  %v207_v17 = vld [vmem:[%s407_s4] sm:$0x1] }
   0x7   :  { %87 = vperm.xlu0 %274, %v22_v1   ;;  %v52_v33 = vsub.s32 0, %v51_v31  ;;  %v76_v34 = vsub.s32 1, %v51_v31  ;;  %v21_v36 = vld [vmem:[%s403_s0] sm:$0xf]  ;;  %v104_v40 = vsub.s32 2, %v51_v31  ;;  %v132_v42 = vsub.s32 3, %v51_v31 }
   0x8   :  { %s315_s0 = smov [#allocation2]  }
   0x9   :  { %v53_v38 = vrot.slane %v21_v36, %v52_v33  ;;  %v77_v39 = vrot.slane %v21_v36, %v76_v34  ;;  %v105_v47 = vrot.slane %v21_v36, %v104_v40  ;;  %v133_v51 = vrot.slane %v21_v36, %v132_v42  ;;  %s258_s19 = sshll.u32 %s315_s0, 4  ;;  %s259_s19 = int_to_ptr.vmem [resolvable:$true] %s258_s19 }
   0xa   :  { %273 = vset.pattern.permute.xlu1 %v311_v2  ;;  %s287_s20 = scalar_lea.vmem %s259_s19, 32  ;;  %p292_p1 = scmp.lt.s32.totalorder %s259_s19, %s259_s19 }
   0xb   :  { %63 = vperm.xlu1 %273, %v23_v6   ;;  %95 = vperm.xlu0 %274, %v24_v0   ;;  %p288_p0 = scmp.ne.s32.totalorder %s259_s19, %s287_s20  ;;  %p293_p2 = scmp.lt.s32.totalorder %s287_s20, %s287_s20 }
   0xd   :  { %p294_p3 = por %p293_p2, %p292_p1 }
   0xf   :  { %67 = vperm.xlu1 %273, %v24_v0   ;;  %278 = vset.pattern.permute.xlu0 %v314_v7  ;;  %p295_p4 = pnand %p294_p3, %p288_p0 }
  0x10   :  { %119 = vperm.xlu0 %278, %v23_v6  }
  0x13   :  { %275 = vset.pattern.permute.xlu1 %v313_v5 }
  0x14   :  { %91 = vperm.xlu1 %275, %v23_v6   ;;  %127 = vperm.xlu0 %278, %v25_v4  }
  0x18   :  { %276 = vset.pattern.permute.xlu1 %v311_v2  ;;  %281 = vset.pattern.permute.xlu0 %v312_v3 }
  0x19   :  { %71 = vperm.xlu1 %276, %v25_v4   ;;  %32 = vperm.xlu0 %281, %v22_v1  }
  0x1d   :  { %277 = vset.pattern.permute.xlu1 %v314_v7  ;;  %37 = vperm.xlu0 %281, %v23_v6  }
  0x1e   :  { %115 = vperm.xlu1 %277, %v22_v1  }
  0x21   :  { %153 = vperm.xlu0 %281, %v143_v8  }
  0x22   :  { %279 = vset.pattern.permute.xlu1 %v313_v5 }
  0x23   :  { %99 = vperm.xlu1 %279, %v25_v4  }
  0x25   :  { %176 = vperm.xlu0 %281, %v26_v9  }
  0x27   :  { %280 = vset.pattern.permute.xlu1 %v314_v7 }
  0x28   :  { %123 = vperm.xlu1 %280, %v24_v0  }
  0x29   :  { %283 = vset.pattern.permute.xlu0 %v311_v2 }
  0x2a   :  { %216 = vperm.xlu0 %283, %v26_v9  }
  0x2c   :  { %282 = vset.pattern.permute.xlu1 %v312_v3 }
  0x2d   :  { %148 = vperm.xlu1 %282, %v142_v10  }
  0x2e   :  { %224 = vperm.xlu0 %283, %v28_v11  }
  0x31   :  { %158 = vperm.xlu1 %282, %v144_v12  }
  0x32   :  { %228 = vperm.xlu0 %283, %v29_v13  }
  0x35   :  { %163 = vperm.xlu1 %282, %v145_v14  }
  0x36   :  { %286 = vset.pattern.permute.xlu0 %v312_v3 }
  0x37   :  { %247 = vperm.xlu0 %286, %v244_v15  }
  0x39   :  { %181 = vperm.xlu1 %282, %v27_v16  }
  0x3d   :  { %284 = vset.pattern.permute.xlu1 %v311_v2 }
  0x3e   :  { %220 = vperm.xlu1 %284, %v27_v16  }
  0x42   :  { %285 = vset.pattern.permute.xlu1 %v312_v3 }
  0x43   :  { %186 = vperm.xlu1 %285, %v28_v11  }
  0x47   :  { %191 = vperm.xlu1 %285, %v29_v13  }
  0x4b   :  { %210 = vperm.xlu1 %285, %v207_v17  }
  0x81   :  { %v43_v18 = vpop.permute.xlu1 %42  ;;  %v60_v19 = vpop.permute.xlu0 %59 }
  0x82   :  { %v78_v46 = vmul.f32 %v77_v39, %v60_v19  ;;  %v56_v55 = vmul.f32 %v53_v38, %v43_v18 }
  0x85   :  { %v48_v20 = vpop.permute.xlu1 %47 }
  0x86   :  { %v88_v21 = vpop.permute.xlu0 %87  ;;  %v57_v59 = vmul.f32 %v53_v38, %v48_v20 }
  0x87   :  { %v106_v50 = vmul.f32 %v105_v47, %v88_v21 }
  0x8a   :  { %v64_v22 = vpop.permute.xlu1 %63  ;;  %v96_v23 = vpop.permute.xlu0 %95 }
  0x8b   :  { %v79_v48 = vmul.f32 %v77_v39, %v64_v22  ;;  %v108_v60 = vmul.f32 %v105_v47, %v96_v23 }
  0x8e   :  { %v68_v24 = vpop.permute.xlu1 %67 }
  0x8f   :  { %v120_v25 = vpop.permute.xlu0 %119  ;;  %v80_v49 = vmul.f32 %v77_v39, %v68_v24 }
  0x90   :  { %v135_v62 = vmul.f32 %v133_v51, %v120_v25 }
  0x91   :  { %v84_v61 = vadd.f32 %v80_v49, %v56_v55 }
  0x93   :  { %v92_v26 = vpop.permute.xlu1 %91  ;;  %v128_v28 = vpop.permute.xlu0 %127  ;;  %v112_v6 = vadd.f32 %v108_v60, %v84_v61 }
  0x94   :  { %v107_v57 = vmul.f32 %v105_v47, %v92_v26  ;;  %v137_v8 = vmul.f32 %v133_v51, %v128_v28 }
  0x98   :  { %v72_v27 = vpop.permute.xlu1 %71  ;;  %v33_v32 = vpop.permute.xlu0 %32 }
  0x99   :  { %v54_v43 = vmul.f32 %v53_v38, %v33_v32  ;;  %v81_v58 = vmul.f32 %v77_v39, %v72_v27 }
  0x9b   :  { %v82_v52 = vadd.f32 %v78_v46, %v54_v43  ;;  %v85_v4 = vadd.f32 %v81_v58, %v57_v59 }
  0x9c   :  { %v38_v37 = vpop.permute.xlu0 %37 }
  0x9d   :  { %v116_v30 = vpop.permute.xlu1 %115  ;;  %v55_v44 = vmul.f32 %v53_v38, %v38_v37  ;;  %v110_v2 = vadd.f32 %v106_v50, %v82_v52 }
  0x9e   :  { %v134_v63 = vmul.f32 %v133_v51, %v116_v30 }
  0x9f   :  { %v83_v53 = vadd.f32 %v79_v48, %v55_v44 }
  0xa0   :  { %v154_v45 = vpop.permute.xlu0 %153  ;;  %v138_v11 = vadd.f32 %v134_v63, %v110_v2 }
  0xa1   :  { %v111_v1 = vadd.f32 %v107_v57, %v83_v53 }
  0xa2   :  { %v100_v35 = vpop.permute.xlu1 %99 }
  0xa3   :  { %v109_v0 = vmul.f32 %v105_v47, %v100_v35  ;;  %v139_v10 = vadd.f32 %v135_v62, %v111_v1 }
  0xa4   :  { %v177_v56 = vpop.permute.xlu0 %176 }
  0xa5   :  { %v113_v9 = vadd.f32 %v109_v0, %v85_v4  ;;  %v167_v15 = vadd.f32 %v154_v45, %v139_v10 }
  0xa7   :  { %v124_v41 = vpop.permute.xlu1 %123  ;;  %v141_v17 = vadd.f32 %v137_v8, %v113_v9  ;;  %v171_v22 = vmax.f32 %v167_v15, 0.0 }
  0xa8   :  { %v136_v5 = vmul.f32 %v133_v51, %v124_v41 }
  0xa9   :  { %v217_v7 = vpop.permute.xlu0 %216 }
  0xaa   :  { %v140_v14 = vadd.f32 %v136_v5, %v112_v6 }
  0xac   :  { %v149_v54 = vpop.permute.xlu1 %148 }
  0xad   :  { %v166_v13 = vadd.f32 %v149_v54, %v138_v11  ;;  %v225_v19 = vpop.permute.xlu0 %224 }
  0xaf   :  { %v170_v20 = vmax.f32 %v166_v13, 0.0 }
  0xb0   :  { %v159_v3 = vpop.permute.xlu1 %158 }
  0xb1   :  { %v168_v16 = vadd.f32 %v159_v3, %v140_v14  ;;  %v231_v25 = vmul.f32 %v217_v7, %v170_v20  ;;  %v229_v28 = vpop.permute.xlu0 %228  ;;  %v194_v35 = vmul.f32 %v177_v56, %v170_v20 }
  0xb3   :  { %v172_v23 = vmax.f32 %v168_v16, 0.0 }
  0xb4   :  { %v164_v12 = vpop.permute.xlu1 %163 }
  0xb5   :  { %v169_v21 = vadd.f32 %v164_v12, %v141_v17  ;;  %v233_v29 = vmul.f32 %v225_v19, %v172_v23 }
  0xb6   :  { %v248_v51 = vpop.permute.xlu0 %247 }
  0xb7   :  { %v173_v26 = vmax.f32 %v169_v21, 0.0 }
  0xb8   :  { %v182_v18 = vpop.permute.xlu1 %181 }
  0xb9   :  { %v195_v31 = vmul.f32 %v182_v18, %v171_v22  ;;  %v234_v32 = vmul.f32 %v229_v28, %v173_v26 }
  0xbb   :  { %v198_v38 = vadd.f32 %v195_v31, %v194_v35 }
  0xbd   :  { %v221_v24 = vpop.permute.xlu1 %220 }
  0xbe   :  { %v232_v27 = vmul.f32 %v221_v24, %v171_v22 }
  0xc0   :  { %v235_v30 = vadd.f32 %v232_v27, %v231_v25 }
  0xc2   :  { %v236_v33 = vadd.f32 %v235_v30, %v233_v29  ;;  %v187_v34 = vpop.permute.xlu1 %186 }
  0xc3   :  { %v196_v36 = vmul.f32 %v187_v34, %v172_v23 }
  0xc4   :  { %v237_v37 = vadd.f32 %v236_v33, %v234_v32 }
  0xc5   :  { %v199_v41 = vadd.f32 %v198_v38, %v196_v36 }
  0xc6   :  { %v192_v39 = vpop.permute.xlu1 %191  ;;  %v238_v40 = vrot.slane %v237_v37, 4 }
  0xc7   :  { %v197_v42 = vmul.f32 %v192_v39, %v173_v26 }
  0xc8   :  { %v239_v43 = vadd.f32 %v238_v40, %v237_v37 }
  0xc9   :  { %v200_v44 = vadd.f32 %v199_v41, %v197_v42 }
  0xca   :  { %v240_v45 = vrot.slane %v239_v43, 2  ;;  %v211_v57 = vpop.permute.xlu1 %210 }
  0xcb   :  { %v201_v46 = vrot.slane %v200_v44, 4 }
  0xcc   :  { %v241_v47 = vadd.f32 %v240_v45, %v239_v43 }
  0xcd   :  { %v202_v48 = vadd.f32 %v201_v46, %v200_v44 }
  0xce   :  { %v242_v49 = vrot.slane %v241_v47, 1 }
  0xcf   :  { %v203_v50 = vrot.slane %v202_v48, 2 }
  0xd0   :  { %v243_v52 = vadd.f32 %v242_v49, %v241_v47 }
  0xd1   :  { %v204_v53 = vadd.f32 %v203_v50, %v202_v48 }
  0xd2   :  { %v250_v54 = vadd.f32 %v248_v51, %v243_v52 }
  0xd3   :  { %v205_v55 = vrot.slane %v204_v53, 1 }
  0xd4   :  { %251 = vst [vmem:[#allocation2 + $0x1] sm:$0x1] %v250_v54 }
  0xd5   :  { %v206_v56 = vadd.f32 %v205_v55, %v204_v53 }
  0xd7   :  { %v213_v58 = vadd.f32 %v211_v57, %v206_v56 }
  0xd9   :  { %214 = vst [vmem:[#allocation2] sm:$0x1] %v213_v58 }
  0xda   :  { %298 = shalt.err (!%p295_p4)
}
  0xdb   :  { %s299_s23 = scalar_lea.hbm %s408_s5, 32 }
  0xdc   :  { %p300_p5 = scmp.ne.s32.totalorder %s408_s5, %s299_s23  ;;  %p303_p6 = scmp.lt.u32.totalorder %s299_s23, %s408_s5 }
  0xde   :  { %p305_p7 = pnand %p303_p6, %p300_p5 }
  0xe0   :  { %308 = shalt.err (!%p305_p7)
}
  0xe1   :  { %261 = dma.vmem_to_hbm [thread:$0]  %s259_s19, 32, %s408_s5, [#allocation3]  }
  0xe2   :  { %309 = dma.done.wait [#allocation3], 32  }
  0xe3   :  { %310 = vsyncadd [#allocation3], 4294967264 }
  0xe4   :  { %265 = vsyncpa [#allocation3], 1 }

</bundles_post_ra>
